<compile_context>
chip_gen: v7x
topology: tpu7x:2x2x1
jax: 0.10.0
libtpu: 0.0.40
codegen_flags: <defaults>
</compile_context>

<pallas_src>
import functools

import jax
import jax.numpy as jnp
from jax.experimental import pallas as pl
from jax.experimental.pallas import tpu as pltpu

EPS = 1e-5
LANE = 128
SUBLANE = 8

# Whole-problem-in-VMEM fast path threshold (bytes per input operand).
_FAST_PATH_BYTES = 1 << 20

# Tiled path: size the row-tile from a VMEM budget.
# Per tile row (128 f32 lanes = 512 B):
#   2 inputs x 2 pipeline buffers x 512 B              = 2048 B
#   2 half-width f32 accumulators x (512 B / 2)        =  512 B
_BYTES_PER_TILE_ROW = 2 * 2 * LANE * 4 + 2 * (LANE * 4) // 2      # = 2560
_VMEM_BUDGET_BYTES = 20 << 20
_TILE_R_MAX = ((_VMEM_BUDGET_BYTES // _BYTES_PER_TILE_ROW)
               // (2 * SUBLANE)) * (2 * SUBLANE)                   # = 8192 rows


def _cdiv(a, b):
    return (a + b - 1) // b


def _round_up(x, m):
    return ((x + m - 1) // m) * m


def _num_feature_groups(num_tiles):
    """Split the feature reduction across 2 groups only on 2-TensorCore chips."""
    if num_tiles < 2:
        return 1
    try:
        kind = (getattr(jax.devices()[0], "device_kind", "") or "").lower()
    except Exception:  # pragma: no cover - defensive, fall back to 1 group
        kind = ""
    return 2 if ("v7" in kind or "7x" in kind) else 1


# ---------------------------------------------------------------------------
# Fast path: whole problem resident in VMEM, single grid step.
# ---------------------------------------------------------------------------
def _dice_small_kernel(pre_ref, tar_ref, inter_ref, union_ref):
    p = pre_ref[...].astype(jnp.float32)            # (N, F)
    t = tar_ref[...].astype(jnp.float32)
    inter_ref[...] = jnp.sum(p * t, axis=-1, keepdims=True)
    union_ref[...] = jnp.sum(p + t, axis=-1, keepdims=True)


# ---------------------------------------------------------------------------
# Tiled path: per-sample (rows, 128) layout, sublane dense, big tiles.
# ---------------------------------------------------------------------------
def _dice_tiled_kernel(pre_ref, tar_ref, inter_ref, union_ref,
                       inter_acc, union_acc, *,
                       rows, tile_r, tiles_per_group, needs_mask):
    """Grid: (groups [parallel], samples [parallel], row-tiles [reduction]).

    pre_ref / tar_ref : (1, tile_r, 128) contiguous tiles of one sample.
    inter_ref / union_ref : (1, 1, 1, 128) lane-dense per-(group, sample) partials.
    *_acc : (tile_r // 2, 128) f32 VMEM accumulators.
    """
    g = pl.program_id(0)
    k = pl.program_id(2)
    half = tile_r // 2

    @pl.when(k == 0)
    def _init():
        inter_acc[...] = jnp.zeros_like(inter_acc)
        union_acc[...] = jnp.zeros_like(union_acc)

    def _accumulate(p, t):
        # Two sub-tiles per step: halves accumulator RMW traffic and VMEM.
        inter_acc[...] += p[:half] * t[:half] + p[half:] * t[half:]
        union_acc[...] += (p[:half] + t[:half]) + (p[half:] + t[half:])

    if not needs_mask:
        _accumulate(pre_ref[0].astype(jnp.float32),
                    tar_ref[0].astype(jnp.float32))
    else:
        # Logical (unclamped) first row of this tile.  It crosses `rows` only
        # on the single ragged edge tile, and is >= rows for the (fully
        # masked) clamped duplicate tile of a short group.
        row0 = (g * tiles_per_group + k) * tile_r
        is_full = row0 + tile_r <= rows

        @pl.when(is_full)
        def _interior():          # hot path: no masking work at all
            _accumulate(pre_ref[0].astype(jnp.float32),
                        tar_ref[0].astype(jnp.float32))

        @pl.when(jnp.logical_not(is_full))
        def _edge():              # cold path: at most one tile per group
            p = pre_ref[0].astype(jnp.float32)
            t = tar_ref[0].astype(jnp.float32)
            r = row0 + jax.lax.broadcasted_iota(jnp.int32, p.shape, 0)
            valid = r < rows
            # Zero BOTH operands so neither sum can see OOB garbage (even NaN).
            _accumulate(jnp.where(valid, p, 0.0), jnp.where(valid, t, 0.0))

    @pl.when(k == pl.num_programs(2) - 1)
    def _finalize():
        # Reduce only down to 128 lanes (lane-dense, unmasked store); the
        # final 128-lane sum happens in the wrapper.
        inter_ref[0, 0, :, :] = jnp.sum(inter_acc[...], axis=0, keepdims=True)
        union_ref[0, 0, :, :] = jnp.sum(union_acc[...], axis=0, keepdims=True)


def _dice_sums_tiled(pre, tar):
    """Per-sample intersection/union sums via the tiled kernel. pre/tar: (N, F)."""
    n, f = pre.shape
    r = f // LANE                 # full 128-lane rows per sample
    f_main = r * LANE

    tile_r = min(_TILE_R_MAX, _round_up(r, 2 * SUBLANE))
    num_tiles = _cdiv(r, tile_r)
    n_groups = _num_feature_groups(num_tiles)
    tiles_per_group = _cdiv(num_tiles, n_groups)
    needs_mask = (num_tiles * tile_r != r) or (n_groups * tiles_per_group != num_tiles)

    # Lane/sublane-dense per-sample view.  Free (pure reshape) when F is a
    # multiple of 128; otherwise XLA copies the 128-aligned prefix once and
    # the (< 128 elements/sample) tail is reduced below with plain jnp.
    pre_main = pre if f_main == f else pre[:, :f_main]
    tar_main = tar if f_main == f else tar[:, :f_main]
    pre3 = pre_main.reshape(n, r, LANE)
    tar3 = tar_main.reshape(n, r, LANE)

    if n_groups * tiles_per_group == num_tiles:
        def in_map(g, i, k):
            return (i, g * tiles_per_group + k, 0)
    else:
        # Keep the (fully masked) phantom tile of the short group in-bounds.
        def in_map(g, i, k):
            return (i, jnp.minimum(g * tiles_per_group + k, num_tiles - 1), 0)

    kernel = functools.partial(
        _dice_tiled_kernel, rows=r, tile_r=tile_r,
        tiles_per_group=tiles_per_group, needs_mask=needs_mask)

    inter_p, union_p = pl.pallas_call(
        kernel,
        out_shape=(
            jax.ShapeDtypeStruct((n_groups, n, 1, LANE), jnp.float32),
            jax.ShapeDtypeStruct((n_groups, n, 1, LANE), jnp.float32),
        ),
        grid_spec=pltpu.PrefetchScalarGridSpec(
            num_scalar_prefetch=0,
            grid=(n_groups, n, tiles_per_group),
            in_specs=[
                pl.BlockSpec((1, tile_r, LANE), in_map),
                pl.BlockSpec((1, tile_r, LANE), in_map),
            ],
            out_specs=(
                pl.BlockSpec((1, 1, 1, LANE), lambda g, i, k: (g, i, 0, 0)),
                pl.BlockSpec((1, 1, 1, LANE), lambda g, i, k: (g, i, 0, 0)),
            ),
            scratch_shapes=[
                pltpu.VMEM((tile_r // 2, LANE), jnp.float32),  # intersection acc
                pltpu.VMEM((tile_r // 2, LANE), jnp.float32),  # union acc
            ],
        ),
        compiler_params=pltpu.CompilerParams(
            dimension_semantics=("parallel", "parallel", "arbitrary"),
            vmem_limit_bytes=32 * 1024 * 1024,
        ),
    )(pre3, tar3)

    intersection = jnp.sum(inter_p, axis=(0, 2, 3))          # (N,)
    union = jnp.sum(union_p, axis=(0, 2, 3))                 # (N,)

    if f_main < f:   # tiny (< 128 elements/sample) tail, reduced with plain jnp
        tail_p = pre[:, f_main:].astype(jnp.float32)
        tail_t = tar[:, f_main:].astype(jnp.float32)
        intersection = intersection + jnp.sum(tail_p * tail_t, axis=-1)
        union = union + jnp.sum(tail_p + tail_t, axis=-1)
    return intersection, union


@jax.jit
def dice_loss(predict, target):
    """predict, target: [N, C, *] (same shape) -> per-sample score [N]."""
    assert predict.shape == target.shape, (
        "the size of predict and target must be equal."
    )
    n = predict.shape[0]
    pre = predict.reshape(n, -1)
    tar = target.reshape(n, -1)
    f = pre.shape[1]
    per_input_bytes = n * f * predict.dtype.itemsize

    if f < LANE:
        # TODO(synk): degenerate tiny-feature case (F < one lane row); a
        # Pallas kernel adds nothing here, use a plain XLA reduction.
        p32 = pre.astype(jnp.float32)
        t32 = tar.astype(jnp.float32)
        intersection = jnp.sum(p32 * t32, axis=-1)
        union = jnp.sum(p32 + t32, axis=-1)
    elif per_input_bytes <= _FAST_PATH_BYTES:
        inter, uni = pl.pallas_call(
            _dice_small_kernel,
            out_shape=(
                jax.ShapeDtypeStruct((n, 1), jnp.float32),
                jax.ShapeDtypeStruct((n, 1), jnp.float32),
            ),
        )(pre, tar)
        intersection = inter[:, 0]
        union = uni[:, 0]
    else:
        intersection, union = _dice_sums_tiled(pre, tar)

    return 1.0 - 2.0 * (intersection + EPS) / (union + EPS)


# ---------------------------------------------------------------------------
# Reference + self test
# ---------------------------------------------------------------------------
def _reference_dice_loss(predict, target):
    n = predict.shape[0]
    pre = predict.reshape(n, -1).astype(jnp.float32)
    tar = target.reshape(n, -1).astype(jnp.float32)
    intersection = jnp.sum(pre * tar, axis=-1)
    union = jnp.sum(pre + tar, axis=-1)
    return 1.0 - 2.0 * (intersection + EPS) / (union + EPS)


def _make_inputs(key, n, c, h, w):
    k1, k2 = jax.random.split(key)
    logits = jax.random.normal(k1, (n, c, h, w), dtype=jnp.float32)
    predict = jax.nn.softmax(logits, axis=1)                       # [N,C,H,W]
    labels = jax.random.randint(k2, (n, h, w), 0, c)
    target = jax.nn.one_hot(labels, c, axis=1, dtype=jnp.float32)  # [N,C,H,W]
    return predict, target


def _check(got, want):
    got = jax.block_until_ready(got)
    assert jnp.allclose(got, want, atol=5e-5, rtol=1e-4), (got, want)


if __name__ == "__main__":
    key = jax.random.PRNGKey(0)
    k1, k2, k3, k4 = jax.random.split(key, 4)

    # 1) Primary spec-scale shape (fast single-block path): N=2, C=4, 16x16.
    predict, target = _make_inputs(k1, 2, 4, 16, 16)
    score = dice_loss(predict, target)
    jax.block_until_ready(score)
    assert score.shape == (2,)
    _check(score, _reference_dice_loss(predict, target))

    # 2) Fast path with a non-power-of-two feature length (F = 3*48*32 = 4608).
    predict, target = _make_inputs(k2, 2, 3, 48, 32)
    _check(dice_loss(predict, target), _reference_dice_loss(predict, target))

    # 3) Tiled path with ragged rows AND a <128-element tail
    #    (F = 3*300*300 = 270000 -> 2109 lane-rows + 48 tail elements).
    predict, target = _make_inputs(k3, 2, 3, 300, 300)
    _check(dice_loss(predict, target), _reference_dice_loss(predict, target))

    # 4) Tiled path with multi-tile accumulation
    #    (F = 4*512*513 = 1,050,624 -> 8208 lane-rows -> 2 row-tiles of 8192,
    #     the second one pl.when-masked).
    predict, target = _make_inputs(k4, 2, 4, 512, 513)
    _check(dice_loss(predict, target), _reference_dice_loss(predict, target))

    print("KERNEL_OK")
</pallas_src>

<mosaic_0001>
module attributes {stable_mosaic.version = 11 : i64} {
  func.func @_dice_small_kernel(%arg0: memref<2x1024xf32, #tpu.memory_space<vmem>>, %arg1: memref<2x1024xf32, #tpu.memory_space<vmem>>, %arg2: memref<2x1xf32, #tpu.memory_space<vmem>>, %arg3: memref<2x1xf32, #tpu.memory_space<vmem>>) attributes {dimension_semantics = [], scalar_prefetch = 0 : i64, scratch_operands = 0 : i64, tpu.core_type = #tpu.core_type<tc>} {
    %c0 = arith.constant 0 : index
    %c0_0 = arith.constant 0 : index
    %0 = vector.load %arg0[%c0, %c0_0] : memref<2x1024xf32, #tpu.memory_space<vmem>>, vector<2x1024xf32>
    %c0_1 = arith.constant 0 : index
    %c0_2 = arith.constant 0 : index
    %1 = vector.load %arg1[%c0_1, %c0_2] : memref<2x1024xf32, #tpu.memory_space<vmem>>, vector<2x1024xf32>
    %2 = arith.mulf %0, %1 : vector<2x1024xf32>
    %cst = arith.constant dense<0.000000e+00> : vector<2xf32>
    %3 = vector.multi_reduction <add>, %2, %cst [1] : vector<2x1024xf32> to vector<2xf32>
    %4 = vector.shape_cast %3 : vector<2xf32> to vector<2x1xf32>
    %c0_3 = arith.constant 0 : index
    %c0_4 = arith.constant 0 : index
    %5 = vector.load %arg2[%c0_3, %c0_4] : memref<2x1xf32, #tpu.memory_space<vmem>>, vector<2x1xf32>
    tpu.vector_store %arg2[%c0_3, %c0_4], %4 {strides = array<i32>} : memref<2x1xf32, #tpu.memory_space<vmem>>, vector<2x1xf32>,
    %6 = arith.addf %0, %1 : vector<2x1024xf32>
    %cst_5 = arith.constant dense<0.000000e+00> : vector<2xf32>
    %7 = vector.multi_reduction <add>, %6, %cst_5 [1] : vector<2x1024xf32> to vector<2xf32>
    %8 = vector.shape_cast %7 : vector<2xf32> to vector<2x1xf32>
    %c0_6 = arith.constant 0 : index
    %c0_7 = arith.constant 0 : index
    %9 = vector.load %arg3[%c0_6, %c0_7] : memref<2x1xf32, #tpu.memory_space<vmem>>, vector<2x1xf32>
    tpu.vector_store %arg3[%c0_6, %c0_7], %8 {strides = array<i32>} : memref<2x1xf32, #tpu.memory_space<vmem>>, vector<2x1xf32>,
    return
  }
}

</mosaic_0001>

<bundles_post_ra>
// kernel: dice_loss.1
= control target key start
LH: loop header
LB: loop body
LE: loop exit
PB: predicated region body
PF: predicated region fallthrough
CT: control target
= control target key end

     0   :  { %v25_v0 = vlaneseq  ;;  %v156_v3 = vmov 1983009808   ;;  %vm63_vm0 = vcmask 1041408   ;;  %vm81_vm1 = vcmask 1024   ;;  %s211_s0 = inlined_call_operand.vmem [shape: f32[2,1024], index: 0, kind: input, shape index: {}]   ;;  %s212_s1 = inlined_call_operand.vmem [shape: f32[2,1024], index: 1, kind: input, shape index: {}]   ;;  %s213_s2 = inlined_call_operand.vmem [shape: f32[2,1], index: 2, kind: output, shape index: {0}]   ;;  %s214_s3 = inlined_call_operand.vmem [shape: f32[2,1], index: 3, kind: output, shape index: {1}]  }
   0x1   :  { %v13_v1 = vld [vmem:[%s211_s0] sm:$0xff]  ;;  %v23_v4 = vunpack.c.l.s4 %v156_v3  ;;  %v14_v5 = vld [vmem:[%s211_s0 + $0x8] sm:$0xff] }
   0x2   :  { %v15_v2 = vld [vmem:[%s212_s1] sm:$0xff]  ;;  %v16_v6 = vld [vmem:[%s212_s1 + $0x8] sm:$0xff]  ;;  %v26_v8 = vshrl.u32 %v25_v0, 7 }
   0x3   :  { %v17_v7 = vmul.f32 %v15_v2, %v13_v1  ;;  %v83_v9 = vadd.f32 %v15_v2, %v13_v1  ;;  %v24_v10 = vunpack.c.0.s8 %v23_v4  ;;  %v18_v13 = vmul.f32 %v16_v6, %v14_v5 }
   0x4   :  { %v84_v18 = vadd.f32 %v16_v6, %v14_v5 }
   0x5   :  { %v21_v11 = vcombine.high %v17_v7, %v17_v7  ;;  %v87_v12 = vcombine.high %v83_v9, %v83_v9  ;;  %v27_v14 = vsub.s32 %v24_v10, %v26_v8  ;;  %v38_v22 = vcombine.high %v18_v13, %v18_v13 }
   0x6   :  { %v104_v27 = vcombine.high %v84_v18, %v84_v18 }
   0x7   :  { %v28_v15 = vrot.slane %v17_v7, %v27_v14  ;;  %v35_v16 = vrot.slane %v21_v11, %v27_v14  ;;  %v94_v17 = vrot.slane %v83_v9, %v27_v14  ;;  %v101_v19 = vrot.slane %v87_v12, %v27_v14 }
   0x8   :  { %v45_v23 = vrot.slane %v18_v13, %v27_v14  ;;  %v111_v31 = vrot.slane %v84_v18, %v27_v14  ;;  %v52_v32 = vrot.slane %v38_v22, %v27_v14  ;;  %v118_v42 = vrot.slane %v104_v27, %v27_v14 }
   0x9   :  { %v36_v20 = vcombine.high %v28_v15, %v28_v15  ;;  %v37_v21 = vcombine.high %v35_v16, %v35_v16  ;;  %v64_v24 = vsel %vm63_vm0, %v28_v15, 0.0  ;;  %v67_v26 = vsel %vm63_vm0, %v35_v16, 0.0 }
   0xa   :  { %v102_v29 = vcombine.high %v94_v17, %v94_v17  ;;  %v103_v30 = vcombine.high %v101_v19, %v101_v19  ;;  %v53_v33 = vcombine.high %v45_v23, %v45_v23  ;;  %v129_v35 = vsel %vm63_vm0, %v94_v17, 0.0 }
   0xb   :  { %v65_v25 = vsel %vm63_vm0, %v36_v20, 0.0  ;;  %v69_v34 = vsel %vm63_vm0, %v37_v21, 0.0  ;;  %v132_v38 = vsel %vm63_vm0, %v101_v19, 0.0  ;;  %v71_v39 = vsel %vm63_vm0, %v45_v23, 0.0 }
   0xc   :  { %v66_v28 = vadd.f32 %v65_v25, %v64_v24  ;;  %v130_v37 = vsel %vm63_vm0, %v102_v29, 0.0  ;;  %v119_v43 = vcombine.high %v111_v31, %v111_v31  ;;  %v134_v44 = vsel %vm63_vm0, %v103_v30, 0.0 }
   0xd   :  { %v131_v40 = vadd.f32 %v130_v37, %v129_v35  ;;  %v54_v45 = vcombine.high %v52_v32, %v52_v32  ;;  %v73_v46 = vsel %vm63_vm0, %v53_v33, 0.0  ;;  %v136_v49 = vsel %vm63_vm0, %v111_v31, 0.0 }
   0xe   :  { %v68_v36 = vadd.f32 %v67_v26, %v66_v28  ;;  %v75_v50 = vsel %vm63_vm0, %v52_v32, 0.0  ;;  %v120_v53 = vcombine.high %v118_v42, %v118_v42  ;;  %v138_v54 = vsel %vm63_vm0, %v119_v43, 0.0 }
   0xf   :  { %v133_v47 = vadd.f32 %v132_v38, %v131_v40  ;;  %v77_v55 = vsel %vm63_vm0, %v54_v45, 0.0  ;;  %v140_v58 = vsel %vm63_vm0, %v118_v42, 0.0 }
  0x10   :  { %v70_v41 = vadd.f32 %v69_v34, %v68_v36  ;;  %v142_v61 = vsel %vm63_vm0, %v120_v53, 0.0 }
  0x11   :  { %v135_v51 = vadd.f32 %v134_v44, %v133_v47 }
  0x12   :  { %v72_v48 = vadd.f32 %v71_v39, %v70_v41 }
  0x13   :  { %v137_v56 = vadd.f32 %v136_v49, %v135_v51 }
  0x14   :  { %v74_v52 = vadd.f32 %v73_v46, %v72_v48 }
  0x15   :  { %v139_v59 = vadd.f32 %v138_v54, %v137_v56 }
  0x16   :  { %v76_v57 = vadd.f32 %v75_v50, %v74_v52 }
  0x17   :  { %v141_v62 = vadd.f32 %v140_v58, %v139_v59 }
  0x18   :  { %v78_v60 = vadd.f32 %v77_v55, %v76_v57 }
  0x19   :  { %v143_v63 = vadd.f32 %v142_v61, %v141_v62 }
  0x1a   :  { %79 = vadd.xlane.f32.xlu0 %v78_v60 }
  0x1e   :  { %144 = vadd.xlane.f32.xlu0 %v143_v63 }
  0xa7   :  { %v80_v0 = vpop.xlane.xlu0 %79 }
  0xa8   :  { %82 = vst.msk [vmem:[%s213_s2] sm:$0x3] %vm81_vm1, %v80_v0 }
  0xab   :  { %v145_v1 = vpop.xlane.xlu0 %144 }
  0xac   :  { %146 = vst.msk [vmem:[%s214_s3] sm:$0x3] %vm81_vm1, %v145_v1 }

</bundles_post_ra>
